<compile_context>
chip_gen: v7x
topology: tpu7x:2x2x1
jax: 0.10.0
libtpu: 0.0.40
codegen_flags: <defaults>
</compile_context>

<pallas_src>
import functools

import jax
import jax.numpy as jnp
from jax.experimental import pallas as pl
from jax.experimental.pallas import tpu as pltpu


def _round_up(x, m):
    return (x + m - 1) // m * m


def center_loss_ref(label, feat, centers, size_average=True):
    """Plain-JAX reference (mirrors the PyTorch CenterlossFunc.forward)."""
    b = feat.shape[0]
    feat = feat.reshape(b, -1).astype(jnp.float32)
    centers_batch = jnp.take(jnp.asarray(centers, jnp.float32),
                             label.astype(jnp.int32), axis=0)
    denom = float(b) if size_average else 1.0
    return jnp.sum((feat - centers_batch) ** 2) / 2.0 / denom


def _center_loss_kernel(label_ref, feat_ref, centers_ref, out_ref,
                        cbuf_ref, acc_ref, *,
                        tiles_per_shard, valid_rows, needs_mask):
    # label_ref   : (R,)      int32      SMEM (scalar prefetch, R = padded rows)
    # feat_ref    : (TB, D)   feat dtype VMEM (auto-pipelined batch tile)
    # centers_ref : (C, D)    float32    VMEM (resident: constant index_map)
    # out_ref     : (1, 1, 1) float32    VMEM (one slot per shard)
    # cbuf_ref    : (TB, D)   float32    VMEM scratch (gathered center rows)
    # acc_ref     : (8, D)    float32    VMEM scratch (elementwise accumulator)
    p = pl.program_id(0)                      # shard (megacore split)
    t = pl.program_id(1)                      # batch tile within the shard
    tb, d = feat_ref.shape
    base = (p * tiles_per_shard + t) * tb

    @pl.when(t == 0)
    def _init():
        acc_ref[...] = jnp.zeros_like(acc_ref)

    # Gather centers[label[base : base+tb]] from the VMEM-resident table with
    # per-row dynamic loads (no per-row HBM DMAs, no semaphores).
    @pl.loop(0, tb)
    def _gather(r):
        idx = label_ref[base + r]
        cbuf_ref[pl.ds(r, 1), :] = centers_ref[pl.ds(idx, 1), :]

    diff = feat_ref[...].astype(jnp.float32) - cbuf_ref[...]
    if needs_mask:
        # Only compiled in when the batch is not tile-aligned; zeroes the
        # contribution of overrun rows in the last tile.
        row = base + jax.lax.broadcasted_iota(jnp.int32, (tb, 1), 0)
        diff = jnp.where(row < valid_rows, diff, 0.0)
    d2 = diff * diff

    # Elementwise partial accumulation: splitting the row axis by 8 keeps vreg
    # tiles intact so the axis-0 sum is plain VPU adds; the costly cross-lane
    # reduction is paid exactly once, below.
    acc_ref[...] += jnp.sum(d2.reshape(tb // 8, 8, d), axis=0)

    @pl.when(t == pl.num_programs(1) - 1)
    def _finalize():
        out_ref[...] = jnp.sum(acc_ref[...]).reshape(1, 1, 1)


def _feat_tile_target_bytes():
    # ~2 MiB per streamed feat buffer on v7x (64 MiB VMEM), ~4 MiB on v5e/v6e.
    try:
        cap = pltpu.get_tpu_info().vmem_capacity_bytes
    except Exception:
        cap = 64 * 1024 * 1024
    return 4 * 1024 * 1024 if cap >= 100 * 1024 * 1024 else 2 * 1024 * 1024


def center_loss(label, feat, centers, size_average=True):
    """Pallas CenterLoss forward. Returns a scalar float32 loss."""
    batch = feat.shape[0]
    feat = feat.reshape(batch, -1)                   # layout-only; no dtype copy
    centers = jnp.asarray(centers, jnp.float32)
    num_classes, feat_dim = centers.shape
    if feat.shape[1] != feat_dim:
        raise ValueError(
            "Center's dim: {0} should be equal to input feature's dim: {1}".format(
                feat_dim, feat.shape[1]))

    denom = float(batch) if size_average else 1.0

    d_pad = _round_up(feat_dim, 128)                 # VMEM lane padding (layout)
    centers_vmem_bytes = _round_up(num_classes, 8) * d_pad * 4
    if centers_vmem_bytes > 8 * 1024 * 1024:
        # TODO(synk): pipelined HBM gather path (double-buffered row DMAs with
        # an aggregate wait) for very large centers tables; fall back to XLA.
        return center_loss_ref(label, feat, centers, size_average)

    itemsize = jnp.dtype(feat.dtype).itemsize
    align = max(8, 32 // itemsize)                   # 8 rows f32, 16 bf16, 32 int8
    row_vmem_bytes = d_pad * itemsize
    target = _feat_tile_target_bytes()
    tb = (target // row_vmem_bytes) // align * align
    tb = max(align, min(2048, tb))
    tb = min(tb, _round_up(batch, align))

    num_tiles = pl.cdiv(batch, tb)
    shards = 2 if (num_tiles >= 2 and num_tiles % 2 == 0) else 1
    tiles_per_shard = num_tiles // shards
    padded_rows = num_tiles * tb
    needs_mask = padded_rows != batch

    # Labels are tiny: pad (padded labels hit row 0, whose rows are masked).
    label_p = jnp.pad(label.astype(jnp.int32).reshape(batch),
                      (0, padded_rows - batch))

    kernel = functools.partial(_center_loss_kernel,
                               tiles_per_shard=tiles_per_shard,
                               valid_rows=batch,
                               needs_mask=needs_mask)

    vmem_bytes = (2 * tb * d_pad * itemsize          # feat double buffer
                  + 2 * centers_vmem_bytes           # resident centers table
                  + tb * d_pad * 4                   # gathered center rows
                  + 8 * d_pad * 4                    # elementwise accumulator
                  + 256 * 1024)                      # output + slack
    vmem_limit = int(min(48 * 1024 * 1024,
                         max(4 * 1024 * 1024, 3 * vmem_bytes // 2)))

    cost = pl.CostEstimate(
        flops=3 * batch * feat_dim,
        transcendentals=0,
        bytes_accessed=(batch * feat_dim * itemsize
                        + num_classes * feat_dim * 4
                        + padded_rows * 4 + shards * 4))

    partials = pl.pallas_call(
        kernel,
        out_shape=jax.ShapeDtypeStruct((shards, 1, 1), jnp.float32),
        grid_spec=pltpu.PrefetchScalarGridSpec(
            num_scalar_prefetch=1,                   # label -> SMEM
            grid=(shards, tiles_per_shard),
            in_specs=[
                # feat: streamed batch tiles, original dtype, no wrapper pad.
                pl.BlockSpec((tb, feat_dim),
                             lambda p, t, lab: (p * tiles_per_shard + t, 0)),
                # centers: whole table resident in VMEM across the grid.
                pl.BlockSpec((num_classes, feat_dim), lambda p, t, lab: (0, 0)),
            ],
            out_specs=pl.BlockSpec((1, 1, 1), lambda p, t, lab: (p, 0, 0)),
            scratch_shapes=[
                pltpu.VMEM((tb, feat_dim), jnp.float32),   # gathered center rows
                pltpu.VMEM((8, feat_dim), jnp.float32),    # elementwise accumulator
            ]),
        compiler_params=pltpu.CompilerParams(
            dimension_semantics=("parallel", "arbitrary"),
            vmem_limit_bytes=vmem_limit),
        cost_estimate=cost,
    )(label_p, feat, centers)

    return jnp.sum(partials) * (0.5 / denom)


# TODO(synk): CenterlossFunc.backward (custom autograd grads w.r.t. feat and
# centers) is not implemented; this script covers the forward pass only.

if __name__ == "__main__":
    num_classes = 10
    feat_dim = 32
    batch = 8

    key = jax.random.PRNGKey(0)
    k_centers, k_feat, k_label = jax.random.split(key, 3)

    # nn.Parameter(torch.randn(num_classes, feat_dim)) — deterministic randn init.
    centers = jax.random.normal(k_centers, (num_classes, feat_dim), jnp.float32)
    feat = jax.random.normal(k_feat, (batch, feat_dim), jnp.float32)
    label = jax.random.randint(k_label, (batch,), 0, num_classes, jnp.int32)

    loss = center_loss(label, feat, centers, size_average=True)
    loss = jax.block_until_ready(loss)

    ref = center_loss_ref(label, feat, centers, size_average=True)
    assert jnp.allclose(loss, ref, rtol=1e-5, atol=1e-5), (loss, ref)

    print("KERNEL_OK")
</pallas_src>

<mosaic_0001>
module attributes {stable_mosaic.version = 11 : i64} {
  func.func @_center_loss_kernel(%arg0: i32, %arg1: i32, %arg2: memref<8xi32, #tpu.memory_space<smem>>, %arg3: memref<8x32xf32, #tpu.memory_space<vmem>>, %arg4: memref<10x32xf32, #tpu.memory_space<vmem>>, %arg5: memref<1x1x1xf32, #tpu.memory_space<vmem>>, %arg6: memref<8x32xf32, #tpu.memory_space<vmem>>, %arg7: memref<8x32xf32, #tpu.memory_space<vmem>>) attributes {dimension_semantics = [#tpu.dimension_semantics<parallel>, #tpu.dimension_semantics<arbitrary>], iteration_bounds = array<i64: 1, 1>, scalar_prefetch = 1 : i64, scratch_operands = 2 : i64, tpu.core_type = #tpu.core_type<tc>, window_params = [{transform_indices = @transform_0, window_bounds = array<i64: 8, 32>}, {pipeline_mode = #tpu.pipeline_mode<synchronous>, transform_indices = @transform_1, window_bounds = array<i64: 10, 32>}, {transform_indices = @transform_2, window_bounds = array<i64: 1, 1, 1>}]} {
    %c1_i32 = arith.constant 1 : i32
    %0 = arith.muli %arg0, %c1_i32 : i32
    %1 = arith.addi %0, %arg1 : i32
    %c8_i32 = arith.constant 8 : i32
    %2 = arith.muli %1, %c8_i32 : i32
    %c0_i32 = arith.constant 0 : i32
    %3 = arith.cmpi eq, %arg1, %c0_i32 : i32
    %4 = arith.extui %3 : i1 to i32
    %c0_i32_0 = arith.constant 0 : i32
    %5 = arith.cmpi ne, %4, %c0_i32_0 : i32
    scf.if %5 {
      %cst_14 = arith.constant 0.000000e+00 : f32
      %19 = vector.broadcast %cst_14 : f32 to vector<8x32xf32>
      %c0_15 = arith.constant 0 : index
      %c0_16 = arith.constant 0 : index
      %20 = vector.load %arg7[%c0_15, %c0_16] : memref<8x32xf32, #tpu.memory_space<vmem>>, vector<8x32xf32>
      tpu.vector_store %arg7[%c0_15, %c0_16], %19 {strides = array<i32>} : memref<8x32xf32, #tpu.memory_space<vmem>>, vector<8x32xf32>,
    } else {
    }
    %c0_i32_1 = arith.constant 0 : i32
    %c8_i32_2 = arith.constant 8 : i32
    %6 = arith.addi %c0_i32_1, %c8_i32_2 : i32
    %c1_i32_3 = arith.constant 1 : i32
    scf.for %arg8 = %c0_i32_1 to %6 step %c1_i32_3  : i32 {
      %c1_i32_14 = arith.constant 1 : i32
      %19 = arith.muli %arg8, %c1_i32_14 : i32
      %c0_i32_15 = arith.constant 0 : i32
      %20 = arith.addi %c0_i32_15, %19 : i32
      %21 = arith.addi %2, %20 : i32
      %22 = arith.index_cast %21 : i32 to index
      %23 = memref.load %arg2[%22] : memref<8xi32, #tpu.memory_space<smem>>
      %24 = arith.index_cast %23 : i32 to index
      %c0_16 = arith.constant 0 : index
      %25 = vector.load %arg4[%24, %c0_16] : memref<10x32xf32, #tpu.memory_space<vmem>>, vector<1x32xf32>
      %26 = arith.index_cast %20 : i32 to index
      %c0_17 = arith.constant 0 : index
      %27 = vector.load %arg6[%26, %c0_17] : memref<8x32xf32, #tpu.memory_space<vmem>>, vector<1x32xf32>
      tpu.vector_store %arg6[%26, %c0_17], %25 {strides = array<i32>} : memref<8x32xf32, #tpu.memory_space<vmem>>, vector<1x32xf32>,
    }
    %c8_i32_4 = arith.constant 8 : i32
    %c0 = arith.constant 0 : index
    %c0_5 = arith.constant 0 : index
    %7 = vector.load %arg3[%c0, %c0_5] : memref<8x32xf32, #tpu.memory_space<vmem>>, vector<8x32xf32>
    %c0_6 = arith.constant 0 : index
    %c0_7 = arith.constant 0 : index
    %8 = vector.load %arg6[%c0_6, %c0_7] : memref<8x32xf32, #tpu.memory_space<vmem>>, vector<8x32xf32>
    %9 = arith.subf %7, %8 : vector<8x32xf32>
    %10 = arith.mulf %9, %9 : vector<8x32xf32>
    %c0_8 = arith.constant 0 : index
    %c0_9 = arith.constant 0 : index
    %11 = vector.load %arg7[%c0_8, %c0_9] : memref<8x32xf32, #tpu.memory_space<vmem>>, vector<8x32xf32>
    %12 = vector.shape_cast %10 : vector<8x32xf32> to vector<1x8x32xf32>
    %cst = arith.constant dense<0.000000e+00> : vector<8x32xf32>
    %13 = vector.multi_reduction <add>, %12, %cst [0] : vector<1x8x32xf32> to vector<8x32xf32>
    %14 = arith.addf %11, %13 : vector<8x32xf32>
    %c0_10 = arith.constant 0 : index
    %c0_11 = arith.constant 0 : index
    %15 = vector.load %arg7[%c0_10, %c0_11] : memref<8x32xf32, #tpu.memory_space<vmem>>, vector<8x32xf32>
    tpu.vector_store %arg7[%c0_10, %c0_11], %14 {strides = array<i32>} : memref<8x32xf32, #tpu.memory_space<vmem>>, vector<8x32xf32>,
    %c0_i32_12 = arith.constant 0 : i32
    %16 = arith.cmpi eq, %arg1, %c0_i32_12 : i32
    %17 = arith.extui %16 : i1 to i32
    %c0_i32_13 = arith.constant 0 : i32
    %18 = arith.cmpi ne, %17, %c0_i32_13 : i32
    scf.if %18 {
      %c0_14 = arith.constant 0 : index
      %c0_15 = arith.constant 0 : index
      %19 = vector.load %arg7[%c0_14, %c0_15] : memref<8x32xf32, #tpu.memory_space<vmem>>, vector<8x32xf32>
      %20 = vector.shape_cast %19 : vector<8x32xf32> to vector<1x8x32xf32>
      %cst_16 = arith.constant dense<0.000000e+00> : vector<1xf32>
      %21 = vector.multi_reduction <add>, %20, %cst_16 [1, 2] : vector<1x8x32xf32> to vector<1xf32>
      %22 = vector.shape_cast %21 : vector<1xf32> to vector<1x1x1xf32>
      %23 = vector.extract %22[0, 0, 0] : f32 from vector<1x1x1xf32>
      %24 = vector.broadcast %23 : f32 to vector<1x1x1xf32>
      %c0_17 = arith.constant 0 : index
      %c0_18 = arith.constant 0 : index
      %c0_19 = arith.constant 0 : index
      %25 = vector.load %arg5[%c0_17, %c0_18, %c0_19] : memref<1x1x1xf32, #tpu.memory_space<vmem>>, vector<1x1x1xf32>
      tpu.vector_store %arg5[%c0_17, %c0_18, %c0_19], %24 {strides = array<i32>} : memref<1x1x1xf32, #tpu.memory_space<vmem>>, vector<1x1x1xf32>,
    } else {
    }
    return
  }
  func.func @transform_0(%arg0: i32, %arg1: i32, %arg2: memref<8xi32, #tpu.memory_space<smem>>) -> (i32, i32) {
    %c1_i32 = arith.constant 1 : i32
    %0 = arith.muli %arg0, %c1_i32 : i32
    %1 = arith.addi %0, %arg1 : i32
    %c0_i32 = arith.constant 0 : i32
    %c0_i32_0 = arith.constant 0 : i32
    return %1, %c0_i32 : i32, i32
  }
  func.func @transform_1(%arg0: i32, %arg1: i32, %arg2: memref<8xi32, #tpu.memory_space<smem>>) -> (i32, i32) {
    %c0_i32 = arith.constant 0 : i32
    %c0_i32_0 = arith.constant 0 : i32
    %c0_i32_1 = arith.constant 0 : i32
    return %c0_i32, %c0_i32_0 : i32, i32
  }
  func.func @transform_2(%arg0: i32, %arg1: i32, %arg2: memref<8xi32, #tpu.memory_space<smem>>) -> (i32, i32, i32) {
    %c0_i32 = arith.constant 0 : i32
    %c0_i32_0 = arith.constant 0 : i32
    %c0_i32_1 = arith.constant 0 : i32
    return %arg0, %c0_i32, %c0_i32_0 : i32, i32, i32
  }
}

</mosaic_0001>

<bundles_post_ra>
// kernel: tpu_custom_call.1
= control target key start
LH: loop header
LB: loop body
LE: loop exit
PB: predicated region body
PF: predicated region fallthrough
CT: control target
= control target key end

     0   :  { %s311_s0 = inlined_call_operand.hbm [shape: s32[8], index: 0, kind: input, shape index: {}]   ;;  %s312_s1 = inlined_call_operand.hbm [shape: f32[8,32], index: 1, kind: input, shape index: {}]   ;;  %s313_s2 = inlined_call_operand.hbm [shape: f32[10,32], index: 2, kind: input, shape index: {}]   ;;  %s314_s3 = inlined_call_operand.hbm [shape: f32[1,1,1], index: 3, kind: output, shape index: {}]  }
   0x1   :  { %s134_s14 = scalar_lea.hbm %s311_s0, 16 }
   0x2   :  { %p135_p0 = scmp.ne.s32.totalorder %s311_s0, %s134_s14  ;;  %p138_p1 = scmp.lt.u32.totalorder %s134_s14, %s311_s0 }
   0x4   :  { %p140_p2 = pnand %p138_p1, %p135_p0 }
   0x6   :  { %143 = shalt.err (!%p140_p2)  }
   0x7   :  { %s226_s19 = smov [#allocation5]  }
   0x8   :  { %9 = dma.hbm_to_smem %s311_s0, 16, %s226_s19, [#allocation4] }
   0x9   :  { %214 = dma.done.wait [#allocation4], 16 }
   0xa   :  { %215 = vsyncadd [#allocation4], 4294967280 }
   0xb   :  { %11 = sfence }
   0xc   :  { %12 = vsyncpa [#allocation7], 0 }
   0xd   :  { %13 = vsyncpa [#allocation10], 0 }
   0xe   :  { %14 = vsyncpa [#allocation8], 0  ;;  %s227_s22 = smov [#allocation6]   ;;  %s228_s24 = smov [#allocation9]  }
   0xf   :  { %s24_s23 = sshll.u32 %s227_s22, 4  ;;  %s33_s25 = sshll.u32 %s228_s24, 4  ;;  %s25_s23 = int_to_ptr.vmem [resolvable:$true] %s24_s23  ;;  %s265_s25 = int_to_ptr.vmem [resolvable:$true] %s33_s25 }
  0x10   :  { %s144_s28 = scalar_lea.hbm %s312_s1, 128 }
  0x11   :  { %p145_p3 = scmp.ne.s32.totalorder %s312_s1, %s144_s28  ;;  %p148_p4 = scmp.lt.u32.totalorder %s144_s28, %s312_s1 }
  0x13   :  { %p150_p5 = pnand %p148_p4, %p145_p3 }
  0x15   :  { %153 = shalt.err (!%p150_p5)
}
  0x16   :  { %s154_s5 = scalar_lea.vmem %s25_s23, 128  ;;  %p159_p7 = scmp.lt.s32.totalorder %s25_s23, %s25_s23 }
  0x17   :  { %p155_p6 = scmp.ne.s32.totalorder %s25_s23, %s154_s5  ;;  %p160_p8 = scmp.lt.s32.totalorder %s154_s5, %s154_s5 }
  0x19   :  { %p161_p9 = por %p160_p8, %p159_p7 }
  0x1b   :  { %p162_p10 = pnand %p161_p9, %p155_p6 }
  0x1d   :  { %165 = shalt.err (!%p162_p10)
}
  0x1e   :  { %27 = dma.hbm_to_vmem [thread:$0]  %s312_s1, 128, %s25_s23, [#allocation7]  }
  0x1f   :  { %s166_s10 = scalar_lea.hbm %s313_s2, 256 }
  0x20   :  { %p167_p11 = scmp.ne.s32.totalorder %s313_s2, %s166_s10  ;;  %p170_p12 = scmp.lt.u32.totalorder %s166_s10, %s313_s2 }
  0x22   :  { %p172_p13 = pnand %p170_p12, %p167_p11 }
  0x24   :  { %175 = shalt.err (!%p172_p13)
}
  0x25   :  { %s176_s15 = scalar_lea.vmem %s265_s25, 256  ;;  %p181_p1 = scmp.lt.s32.totalorder %s265_s25, %s265_s25 }
  0x26   :  { %p177_p0 = scmp.ne.s32.totalorder %s265_s25, %s176_s15  ;;  %p182_p2 = scmp.lt.s32.totalorder %s176_s15, %s176_s15 }
  0x28   :  { %p183_p3 = por %p182_p2, %p181_p1 }
  0x2a   :  { %p184_p4 = pnand %p183_p3, %p177_p0 }
  0x2c   :  { %187 = shalt.err (!%p184_p4)
}
  0x2d   :  { %s229_s1 = smov 128   ;;  %s230_s16 = smov 8  }
  0x2e   :  { %39 = dma.hbm_to_vmem [thread:$0]  %s313_s2, 256, %s265_s25, [#allocation10], %s229_s1, %s229_s1, %s230_s16  }
  0x2f   :  { %216 = dma.done.wait [#allocation7], 128  }
  0x30   :  { %217 = vsyncadd [#allocation7], 4294967168 }
  0x31   :  { %218 = dma.done.wait [#allocation10], 256  }
  0x32   :  { %219 = vsyncadd [#allocation10], 4294967040  ;;  %vm53_vm0 = vcmask 261120   ;;  %v231_v0 = vmov 0.0   ;;  %s222_s19 = smov 0  }
  0x33   :  { %54 = vst.msk [vmem:[#allocation3] sm:$0xff] %vm53_vm0, %v231_v0 }
  0x34 LB: > { %s62_s20 = sld [smem:[#allocation5 + %s224_s19]]  ;;  %vm66_vm1 = vcmask 253952   ;;  %s65_s22 = scalar_lea.vmem [#allocation2], %s224_s19  ;;  %s224_s19 = sphi %s222_s19, %s60_s19  }
  0x35   : > { %s60_s19 = sadd.s32 1, %s224_s19  }
  0x36   : > { %p57_p5 = scmp.ge.s32.totalorder %s60_s19, 8  }
  0x37   :  { %v68_v2 = vld [vmem:[#allocation6] sm:$0xff] (%p57_p5)  ;;  %s232_s2 = smov (%p57_p5), [#allocation11]   ;;  %vm92_vm2 = vcmask (%p57_p5), 0  }
  0x38   :  { %59 = sbr.rel (!%p57_p5) target bundleno = 52 (0x34), region = 54  ;;  %s100_s23 = sshll.u32 (%p57_p5), %s232_s2, 4  ;;  %s101_s23 = int_to_ptr.vmem [resolvable:$true] %s100_s23 }
  0x39   :  { %s188_s25 = scalar_lea.vmem (%p57_p5), %s101_s23, 16  ;;  %s192_s26 = scalar_lea.vmem (%p57_p5), %s101_s23, 32 }
  0x3a   : > { %s63_s21 = scalar_lea.vmem [#allocation9], %s62_s20  ;;  %v72_v5 = vld [vmem:[#allocation3] sm:$0xff] (%p57_p5)  ;;  %p189_p6 = scmp.ne.s32.totalorder (%p57_p5), %s101_s23, %s188_s25 }
  0x3b   : > { %v64_v1 = vld [vmem:[%s63_s21] sm:$0x1]  ;;  %p193_p7 = scmp.lt.s32.totalorder (%p57_p5), %s101_s23, %s101_s23  ;;  %p194_p8 = scmp.lt.s32.totalorder (%p57_p5), %s192_s26, %s188_s25 }
  0x3c   : > { %67 = vst.msk [vmem:[%s65_s22] sm:$0x1] %vm66_vm1, %v64_v1 }
  0x3d   :  { %p195_p9 = por (%p57_p5), %p194_p8, %p193_p7 }
  0x3f   :  { %p196_p10 = pnand %p195_p9, %p189_p6 }
  0x43   :  { %v69_v3 = vld [vmem:[#allocation2] sm:$0xff] }
  0x44   :  { %v70_v4 = vsub.f32 %v68_v2, %v69_v3 }
  0x46   :  { %v71_v6 = vmul.f32 %v70_v4, %v70_v4 }
  0x48   :  { %v74_v7 = vadd.f32 %v72_v5, %v71_v6 }
  0x4a   :  { %76 = vst.msk [vmem:[#allocation3] sm:$0xff] %vm53_vm0, %v74_v7 }
  0x51   :  { %v80_v8 = vld [vmem:[#allocation3] sm:$0xff] }
  0x52   :  { %v81_v9 = vsel %vm53_vm0, %v80_v8, 0.0 }
  0x53   :  { %82 = vadd.xlane.f32.xlu0 %v81_v9 }
  0xe0   :  { %v83_v10 = vpop.xlane.xlu0 %82 }
  0xe1   :  { %v84_v11 = vrot.slane %v83_v10, 4 }
  0xe3   :  { %v85_v12 = vadd.f32 %v84_v11, %v83_v10 }
  0xe5   :  { %v86_v13 = vrot.slane %v85_v12, 2 }
  0xe7   :  { %v87_v14 = vadd.f32 %v86_v13, %v85_v12 }
  0xe9   :  { %v88_v15 = vrot.slane %v87_v14, 1 }
  0xeb   :  { %v89_v16 = vadd.f32 %v88_v15, %v87_v14 }
  0xed   :  { %117 = vpush %v89_v16 }
 0x11e   :  { %s118_s24 = spop %117 }
 0x11f   :  { %v91_v17 = vstv %s118_s24 }
 0x120   :  { %93 = vst.msk [vmem:[#allocation11] sm:$0x1] %vm92_vm2, %v91_v17 }
 0x121   :  { %199 = shalt.err (!%p196_p10)
}
 0x122   :  { %s200_s29 = scalar_lea.hbm %s314_s3, 16 }
 0x123   :  { %p201_p11 = scmp.ne.s32.totalorder %s314_s3, %s200_s29  ;;  %p204_p12 = scmp.lt.u32.totalorder %s200_s29, %s314_s3 }
 0x125   :  { %p206_p13 = pnand %p204_p12, %p201_p11 }
 0x127   :  { %209 = shalt.err (!%p206_p13)
}
 0x128   :  { %103 = dma.vmem_to_hbm [thread:$0]  %s101_s23, 16, %s314_s3, [#allocation8]  }
 0x129   :  { %220 = dma.done.wait [#allocation8], 16  }
 0x12a   :  { %221 = vsyncadd [#allocation8], 4294967280 }
 0x12b   :  { %107 = vsyncpa [#allocation7], 1 }
 0x12c   :  { %108 = vsyncpa [#allocation10], 1 }
 0x12d   :  { %109 = vsyncpa [#allocation8], 1 }

</bundles_post_ra>
